<compile_context>
chip_gen: v6e
topology: v6e:2x2x1
jax: 0.10.0
libtpu: 0.0.40
codegen_flags: <defaults>
</compile_context>

<pallas_src>
import numpy as np
import jax
import jax.numpy as jnp
from jax.experimental import pallas as pl
from jax.experimental.pallas import tpu as pltpu


def get_audio_prepro_args(dur, window="hanning", n_fft=256, sr=44100,
                          hop_factor=0.5, stereo=True):
    """JAX/numpy port of the PyTorch helper (n_fft made configurable so the demo can
    run at small shapes; the module default is 4096)."""
    hop_fft = int(np.round(n_fft * hop_factor))
    length_in_samples = int(np.ceil(dur * sr))
    n_frames = int(np.ceil(length_in_samples / hop_fft))
    n_bins = n_fft // 2 + 1
    assert window == "hanning"
    n = np.arange(n_fft)
    # periodic hann == torch.hann_window(n_fft)
    w = (0.5 - 0.5 * np.cos(2.0 * np.pi * n / n_fft)).astype(np.float32)
    return w, n_fft, hop_fft, sr, n_frames, n_bins, length_in_samples, stereo


def _vmem_limit_bytes():
    """Generation-aware VMEM request: leave headroom below physical capacity
    (v7x has only 64 MiB/TC; v5e/v6e have 128 MiB)."""
    mib = 1024 * 1024
    try:
        phys = getattr(pltpu.get_tpu_info(), "vmem_capacity_bytes", 128 * mib)
    except Exception:   # non-TPU / old-runtime fallback
        phys = 128 * mib
    return int(max(32 * mib, min(phys - 16 * mib, 96 * mib)))


def _choose_blk(BC, T, K, tn, vmem_budget, outer_tiles, m_target=1024):
    """How many batch*channel slices to fuse into the matmul M dimension.

    Targets M = BLK*T ~ 1024 rows so each basis/output DMA is amortized over many
    MXU rows, bounded by the per-step VMEM footprint; keeps at least 2 total grid
    steps when possible so both v7x TensorCores get work."""
    def footprint(blk):
        x_b = blk * T * K * 2 * 2              # bf16 spectrogram block, double-buffered
        w_b = K * (2 * tn) * 2 * 2             # bf16 fused basis panel, double-buffered
        c_b = 2 * tn * 4 * 2                   # f32 boundary-row corrections
        o_b = blk * (T + 1) * tn * 4 * 2       # f32 output block, double-buffered
        y_b = blk * T * (2 * tn) * 4           # f32 fused matmul result (live)
        return x_b + w_b + c_b + o_b + y_b

    want = max(1, m_target // max(T, 1))
    divisors = [d for d in range(1, BC + 1) if BC % d == 0]
    blk = 1
    for d in divisors:
        if d <= want and footprint(d) <= vmem_budget:
            blk = d
    if outer_tiles * (BC // blk) < 2:
        for d in reversed(divisors):
            if d < blk and BC // d >= 2 and footprint(d) <= vmem_budget:
                blk = d
                break
    return blk


def _istft_kernel_factory(BLK, T, tn):
    def kernel(x_ref, w_ref, corr_ref, o_ref):
        # x_ref   : (BLK, T, K)    bf16 -- [Re | Im(1:F-1)] spectrogram (K = n_fft)
        # w_ref   : (K, 2*tn)      bf16 -- fused [first-half | second-half] windowed
        #                                  inverse-rFFT basis panel for column tile j,
        #                                  interior OLA envelope already folded in
        # corr_ref: (2, tn)        f32  -- envelope corrections for OLA rows 0 and T
        # o_ref   : (BLK, T+1, tn) f32  -- overlap-added, normalized segments
        k_dim = x_ref.shape[-1]
        x2 = x_ref[...].reshape(BLK * T, k_dim)        # M = BLK*T rows for the MXU
        # single fused MXU matmul (both half-frame panels), f32 accumulation
        y = jnp.dot(x2, w_ref[...], preferred_element_type=jnp.float32)
        y = y.reshape(BLK, T, 2 * tn)
        y0 = y[:, :, :tn]     # frame t's first  half -> OLA row t
        y1 = y[:, :, tn:]     # frame t's second half -> OLA row t+1
        corr = corr_ref[...]
        # 50%-hop overlap-add via slice stores; interior rows are already normalized
        # (envelope folded into the basis), boundary rows get a per-column correction.
        o_ref[:, 0:1, :] = y0[:, 0:1, :] * corr[0:1]
        if T > 1:
            o_ref[:, 1:T, :] = y0[:, 1:, :] + y1[:, :T - 1, :]
        o_ref[:, T:T + 1, :] = y1[:, T - 1:T, :] * corr[1:2]
    return kernel


class ISTFTModulePallas:
    """Pallas equivalent of iSTFTModule.forward."""

    def __init__(self, duration, n_fft=256, sr=44100):
        (self.window, self.n_fft, self.hop, self.sr, self.n_frames,
         self.n_bins, self.length, self.stereo) = get_audio_prepro_args(
            duration, n_fft=n_fft, sr=sr)
        assert 2 * self.hop == self.n_fft, "kernel assumes hop_factor=0.5"
        self.duration = duration

        n_fft, F, hop, T = self.n_fft, self.n_bins, self.hop, self.n_frames
        self.kdim = 2 * F - 2          # == n_fft: zero Im rows (DC, Nyquist) dropped
        self.vmem_limit = _vmem_limit_bytes()

        # Lane-dense output-column tile: multiple of 128 dividing hop (or hop itself).
        if hop % 128 == 0:
            tn = min(hop, 512)
            if self.vmem_limit >= 80 * 1024 * 1024 and hop % 1024 == 0:
                tn = 1024              # bigger tiles on 128-MiB-VMEM chips (v5e/v6e)
        else:
            tn = hop
        assert hop % tn == 0
        self.tn = tn

        # Windowed inverse-rFFT basis (norm='backward', onesided):
        #   x[n] = sum_k a_k (Re X_k cos(2*pi*k*n/N) - Im X_k sin(2*pi*k*n/N))
        #   a_0 = a_{N/2} = 1/N, otherwise 2/N.  The Im rows for k=0 and k=N/2 are
        #   identically zero and are dropped, so the contraction dim is exactly n_fft.
        k = np.arange(F)
        n = np.arange(n_fft)
        ang = 2.0 * np.pi * np.outer(n, k) / n_fft
        scale = np.full((F,), 2.0 / n_fft)
        scale[0] = 1.0 / n_fft
        scale[-1] = 1.0 / n_fft
        wr = np.cos(ang) * scale[None, :] * self.window[:, None]    # (n_fft, F)
        wi = -np.sin(ang) * scale[None, :] * self.window[:, None]   # (n_fft, F)
        wcat = np.concatenate([wr.T, wi.T[1:F - 1]], axis=0)        # (K, n_fft)

        # Squared-window OLA envelope.  All interior OLA rows (1..T-1) see the same
        # per-column envelope env_mid = wsq[:hop] + wsq[hop:] (strictly > 0 for hann,
        # hop = n_fft/2), so 1/env_mid is folded into the basis columns; only OLA rows
        # 0 and T need a per-column correction.  NOTE: torch.istft raises on a
        # (near-)zero envelope (NOLA check); we zero those samples instead — identical
        # results for hann + hop_factor=0.5 since the only such sample is trimmed by
        # the center crop.
        wsq = self.window.astype(np.float64) ** 2
        env_mid = wsq[:hop] + wsq[hop:]
        w0n = wcat[:, :hop] / env_mid[None, :]
        w1n = wcat[:, hop:] / env_mid[None, :]
        # Interleave per-column-tile panels: tile j -> [w0 cols of tile j | w1 cols of
        # tile j], so each grid step DMAs ONE (K, 2*tn) panel and does ONE matmul.
        nt = hop // tn
        wf = np.stack([w0n.reshape(self.kdim, nt, tn),
                       w1n.reshape(self.kdim, nt, tn)], axis=2)     # (K, nt, 2, tn)
        self.wfused = jnp.asarray(wf.reshape(self.kdim, 2 * hop), jnp.bfloat16)

        env0, envT = wsq[:hop], wsq[hop:]
        corr = np.zeros((2, hop), np.float64)
        corr[0] = np.where(env0 > 1e-11, env_mid / np.maximum(env0, 1e-30), 0.0)
        corr[1] = np.where(envT > 1e-11, env_mid / np.maximum(envT, 1e-30), 0.0)
        self.corr = jnp.asarray(corr, jnp.float32)

    def get_input_shape(self):
        return [4 if self.stereo else 2, self.n_frames, self.n_bins]

    def get_out_shape(self):
        return (self.length, 2 if self.stereo else 1)

    def __call__(self, x):
        B, C2, T, F = x.shape
        C = C2 // 2
        assert T == self.n_frames and F == self.n_bins
        hop, tn, K = self.hop, self.tn, self.kdim
        BC = B * C

        # rearrange 'b (c r) t f -> (b c) t f' for re/im planes, drop the unused
        # Im(DC)/Im(Nyquist) bins, concatenate the planes along the contraction axis
        # and cast to bf16 (MXU-native).
        # TODO(synk): keep the spectrogram in f32 if downstream audio quality needs it;
        #             bf16 is validated to ~1e-2 at both demo sizes below.
        x5 = x.reshape(B, C, 2, T, F)
        xr = x5[:, :, 0].reshape(BC, T, F)
        xi = x5[:, :, 1].reshape(BC, T, F)
        xcat = jnp.concatenate([xr, xi[:, :, 1:F - 1]], axis=-1).astype(jnp.bfloat16)

        outer_tiles = hop // tn
        BLK = _choose_blk(BC, T, K, tn, int(0.8 * self.vmem_limit), outer_tiles)
        # batch axis innermost: the basis panel / corrections keep a constant block
        # index along it -> one HBM fetch per column tile instead of per (batch, tile).
        grid = (outer_tiles, BC // BLK)

        kernel = _istft_kernel_factory(BLK, T, tn)
        ola = pl.pallas_call(
            kernel,
            out_shape=jax.ShapeDtypeStruct((BC, T + 1, hop), jnp.float32),
            grid_spec=pltpu.PrefetchScalarGridSpec(
                num_scalar_prefetch=0,
                grid=grid,
                in_specs=[
                    # spectrogram block: streamed along the inner (batch) axis
                    pl.BlockSpec((BLK, T, K), lambda j, b: (b, 0, 0)),
                    # fused basis panel + boundary-row corrections: constant along
                    # the inner axis
                    pl.BlockSpec((K, 2 * tn), lambda j, b: (0, j)),
                    pl.BlockSpec((2, tn), lambda j, b: (0, j)),
                ],
                out_specs=pl.BlockSpec((BLK, T + 1, tn), lambda j, b: (b, 0, j)),
            ),
            compiler_params=pltpu.CompilerParams(
                dimension_semantics=("parallel", "parallel"),
                vmem_limit_bytes=self.vmem_limit),
        )(xcat, self.wfused, self.corr)

        # center trim (drop n_fft//2 == hop samples) and clamp/pad to `length`,
        # exactly as torch.istft(center=True, length=length) does.
        flat = ola.reshape(BC, (T + 1) * hop)
        take = min(self.length, hop * T)
        wave = flat[:, hop:hop + take]
        if take < self.length:
            wave = jnp.pad(wave, ((0, 0), (0, self.length - take)))

        # rearrange '(b c) s -> b s c'
        return wave.reshape(B, C, self.length).transpose(0, 2, 1)


def _reference_numpy(x, mod):
    """Pure numpy reference implementing torch.istft semantics."""
    B, C2, T, F = x.shape
    C = C2 // 2
    hop, n_fft, length, win = mod.hop, mod.n_fft, mod.length, mod.window
    x5 = np.asarray(x, dtype=np.float64).reshape(B, C, 2, T, F)
    xc = (x5[:, :, 0] + 1j * x5[:, :, 1]).reshape(B * C, T, F)
    frames = np.fft.irfft(xc, n=n_fft, axis=-1) * win[None, None, :]
    full = hop * (T + 1)
    y = np.zeros((B * C, full))
    env = np.zeros(full)
    wsq = win.astype(np.float64) ** 2
    for t in range(T):
        y[:, t * hop:t * hop + n_fft] += frames[:, t]
        env[t * hop:t * hop + n_fft] += wsq
    start = n_fft // 2
    end = min(start + length, full)
    seg = y[:, start:end] / env[None, start:end]
    out = np.zeros((B * C, length))
    out[:, :seg.shape[1]] = seg
    return out.reshape(B, C, length).transpose(0, 2, 1)


if __name__ == "__main__":
    k1, k2 = jax.random.split(jax.random.PRNGKey(0))
    B = 2

    # Config 1: small shapes — n_fft=256 (hop=128), duration=0.045 s @ 44.1 kHz
    #   -> length=1985 samples, n_frames=16, n_bins=129, input (2, 4, 16, 129)
    mod = ISTFTModulePallas(0.045, n_fft=256, sr=44100)
    x = jax.random.normal(k1, (B,) + tuple(mod.get_input_shape()), dtype=jnp.float32)
    out = jax.block_until_ready(mod(x))
    assert out.shape == (B,) + tuple(mod.get_out_shape()), out.shape
    ref = _reference_numpy(np.asarray(x), mod)
    # bf16 inputs/basis with f32 accumulation: tolerance 1e-2 (far below the ~0.1
    # error any structural/indexing bug would produce).
    np.testing.assert_allclose(np.asarray(out), ref, atol=1e-2, rtol=1e-2)

    # Config 2: the module's real n_fft=4096 at a tiny duration (0.05 s -> T=2),
    # exercising the full-size contraction dim (K=4096 bf16) and the multi-column-tile
    # grid axis (hop=2048, tn=512/1024).
    mod2 = ISTFTModulePallas(0.05, n_fft=4096, sr=44100)
    x2 = jax.random.normal(k2, (B,) + tuple(mod2.get_input_shape()), dtype=jnp.float32)
    out2 = jax.block_until_ready(mod2(x2))
    assert out2.shape == (B,) + tuple(mod2.get_out_shape()), out2.shape
    ref2 = _reference_numpy(np.asarray(x2), mod2)
    np.testing.assert_allclose(np.asarray(out2), ref2, atol=1e-2, rtol=1e-2)

    print("KERNEL_OK")
</pallas_src>

<mosaic_0001>
module attributes {stable_mosaic.version = 11 : i64} {
  func.func @kernel(%arg0: i32, %arg1: i32, %arg2: memref<2x16x256xbf16, #tpu.memory_space<vmem>>, %arg3: memref<256x256xbf16, #tpu.memory_space<vmem>>, %arg4: memref<2x128xf32, #tpu.memory_space<vmem>>, %arg5: memref<2x17x128xf32, #tpu.memory_space<vmem>>) attributes {dimension_semantics = [#tpu.dimension_semantics<parallel>, #tpu.dimension_semantics<parallel>], iteration_bounds = array<i64: 1, 2>, scalar_prefetch = 0 : i64, scratch_operands = 0 : i64, tpu.core_type = #tpu.core_type<tc>, window_params = [{transform_indices = @transform_0, window_bounds = array<i64: 2, 16, 256>}, {transform_indices = @transform_1, window_bounds = array<i64: 256, 256>}, {transform_indices = @transform_2, window_bounds = array<i64: 2, 128>}, {transform_indices = @transform_3, window_bounds = array<i64: 2, 17, 128>}]} {
    %c0 = arith.constant 0 : index
    %c0_0 = arith.constant 0 : index
    %c0_1 = arith.constant 0 : index
    %0 = vector.load %arg2[%c0, %c0_0, %c0_1] : memref<2x16x256xbf16, #tpu.memory_space<vmem>>, vector<2x16x256xbf16>
    %1 = vector.shape_cast %0 : vector<2x16x256xbf16> to vector<32x256xbf16>
    %c0_2 = arith.constant 0 : index
    %c0_3 = arith.constant 0 : index
    %2 = vector.load %arg3[%c0_2, %c0_3] : memref<256x256xbf16, #tpu.memory_space<vmem>>, vector<256x256xbf16>
    %cst = arith.constant dense<0.000000e+00> : vector<32x256xf32>
    %3 = tpu.matmul %1, %2, %cst {dimension_numbers = #tpu.dot_dimension_numbers<[1], [0], [0], [1], [0, 0, 1, 1], [], []>} : vector<32x256xbf16>, vector<256x256xbf16>, vector<32x256xf32> -> vector<32x256xf32>
    %4 = vector.shape_cast %3 : vector<32x256xf32> to vector<2x16x256xf32>
    %5 = vector.extract_strided_slice %4 {offsets = [0, 0, 0], sizes = [2, 16, 128], strides = [1, 1, 1]} : vector<2x16x256xf32> to vector<2x16x128xf32>
    %6 = vector.extract_strided_slice %4 {offsets = [0, 0, 128], sizes = [2, 16, 128], strides = [1, 1, 1]} : vector<2x16x256xf32> to vector<2x16x128xf32>
    %c0_4 = arith.constant 0 : index
    %c0_5 = arith.constant 0 : index
    %7 = vector.load %arg4[%c0_4, %c0_5] : memref<2x128xf32, #tpu.memory_space<vmem>>, vector<2x128xf32>
    %8 = vector.extract_strided_slice %5 {offsets = [0, 0, 0], sizes = [2, 1, 128], strides = [1, 1, 1]} : vector<2x16x128xf32> to vector<2x1x128xf32>
    %9 = vector.extract_strided_slice %7 {offsets = [0, 0], sizes = [1, 128], strides = [1, 1]} : vector<2x128xf32> to vector<1x128xf32>
    %10 = vector.shape_cast %9 : vector<1x128xf32> to vector<1x1x128xf32>
    %11 = vector.broadcast %10 : vector<1x1x128xf32> to vector<2x1x128xf32>
    %12 = arith.mulf %8, %11 : vector<2x1x128xf32>
    %c0_6 = arith.constant 0 : index
    %c0_7 = arith.constant 0 : index
    %c0_8 = arith.constant 0 : index
    %13 = vector.load %arg5[%c0_6, %c0_7, %c0_8] : memref<2x17x128xf32, #tpu.memory_space<vmem>>, vector<2x1x128xf32>
    tpu.vector_store %arg5[%c0_6, %c0_7, %c0_8], %12 {strides = array<i32>} : memref<2x17x128xf32, #tpu.memory_space<vmem>>, vector<2x1x128xf32>,
    %14 = vector.extract_strided_slice %5 {offsets = [0, 1, 0], sizes = [2, 15, 128], strides = [1, 1, 1]} : vector<2x16x128xf32> to vector<2x15x128xf32>
    %15 = vector.extract_strided_slice %6 {offsets = [0, 0, 0], sizes = [2, 15, 128], strides = [1, 1, 1]} : vector<2x16x128xf32> to vector<2x15x128xf32>
    %16 = arith.addf %14, %15 : vector<2x15x128xf32>
    %c0_9 = arith.constant 0 : index
    %c1 = arith.constant 1 : index
    %c0_10 = arith.constant 0 : index
    %17 = vector.load %arg5[%c0_9, %c1, %c0_10] : memref<2x17x128xf32, #tpu.memory_space<vmem>>, vector<2x15x128xf32>
    tpu.vector_store %arg5[%c0_9, %c1, %c0_10], %16 {strides = array<i32>} : memref<2x17x128xf32, #tpu.memory_space<vmem>>, vector<2x15x128xf32>,
    %18 = vector.extract_strided_slice %6 {offsets = [0, 15, 0], sizes = [2, 1, 128], strides = [1, 1, 1]} : vector<2x16x128xf32> to vector<2x1x128xf32>
    %19 = vector.extract_strided_slice %7 {offsets = [1, 0], sizes = [1, 128], strides = [1, 1]} : vector<2x128xf32> to vector<1x128xf32>
    %20 = vector.shape_cast %19 : vector<1x128xf32> to vector<1x1x128xf32>
    %21 = vector.broadcast %20 : vector<1x1x128xf32> to vector<2x1x128xf32>
    %22 = arith.mulf %18, %21 : vector<2x1x128xf32>
    %c0_11 = arith.constant 0 : index
    %c16 = arith.constant 16 : index
    %c0_12 = arith.constant 0 : index
    %23 = vector.load %arg5[%c0_11, %c16, %c0_12] : memref<2x17x128xf32, #tpu.memory_space<vmem>>, vector<2x1x128xf32>
    tpu.vector_store %arg5[%c0_11, %c16, %c0_12], %22 {strides = array<i32>} : memref<2x17x128xf32, #tpu.memory_space<vmem>>, vector<2x1x128xf32>,
    return
  }
  func.func @transform_0(%arg0: i32, %arg1: i32) -> (i32, i32, i32) {
    %c0_i32 = arith.constant 0 : i32
    %c0_i32_0 = arith.constant 0 : i32
    %c0_i32_1 = arith.constant 0 : i32
    return %arg1, %c0_i32, %c0_i32_0 : i32, i32, i32
  }
  func.func @transform_1(%arg0: i32, %arg1: i32) -> (i32, i32) {
    %c0_i32 = arith.constant 0 : i32
    %c0_i32_0 = arith.constant 0 : i32
    return %c0_i32, %arg0 : i32, i32
  }
  func.func @transform_2(%arg0: i32, %arg1: i32) -> (i32, i32) {
    %c0_i32 = arith.constant 0 : i32
    %c0_i32_0 = arith.constant 0 : i32
    return %c0_i32, %arg0 : i32, i32
  }
  func.func @transform_3(%arg0: i32, %arg1: i32) -> (i32, i32, i32) {
    %c0_i32 = arith.constant 0 : i32
    %c0_i32_0 = arith.constant 0 : i32
    return %arg1, %c0_i32, %arg0 : i32, i32, i32
  }
}

</mosaic_0001>

<bundles_post_ra>
// kernel: tpu_custom_call.1
= control target key start
LH: loop header
LB: loop body
LE: loop exit
PB: predicated region body
PF: predicated region fallthrough
CT: control target
= control target key end

     0   :  { %8 = vsyncpa [#allocation3], 0  ;;  %s1169_s0 = inlined_call_operand.hbm [shape: bf16[4,16,256], index: 0, kind: input, shape index: {}]   ;;  %s1170_s1 = inlined_call_operand.hbm [shape: bf16[256,256], index: 1, kind: input, shape index: {}]   ;;  %s1171_s2 = inlined_call_operand.vmem [shape: f32[2,128], index: 2, kind: input, shape index: {}]   ;;  %s1172_s3 = inlined_call_operand.vmem [shape: f32[4,17,128], index: 3, kind: output, shape index: {}]  }
   0x1   :  { %10 = vsyncpa [#allocation3 + $0x1], 0 }
   0x2   :  { %11 = vsyncpa [#allocation5], 0  ;;  %s1024_s12 = smov 0   ;;  %s1026_s13 = smov 0  }
   0x3   :  { %s1028_s14 = smov 0   ;;  %s1030_s15 = smov 0  }
   0x4   :  { %s1032_s16 = smov 0   ;;  %s1034_s17 = smov 0  }
   0x5 LB: > { %s680_s18 = sadd.s32 4294967295, %s998_s17   ;;  %p49_p0 = scmp.ne.s32.totalorder %s982_s13, %s978_s12  ;;  %s998_s17 = sphi %s1034_s17, %s17_s17   ;;  %s994_s16 = sphi %s1032_s16, %s1182_s16   ;;  %s990_s15 = sphi %s1030_s15, %s1181_s15   ;;  %s986_s14 = sphi %s1028_s14, %s1180_s14   ;;  %s982_s13 = sphi %s1026_s13, %s1179_s13   ;;  %s978_s12 = sphi %s1024_s12, %s1178_s12  }
   0x6   : > { %p1054_p1 = scmp.eq.s32.totalorder %s680_s18, 0  ;;  %p682_p2 = scmp.ge.s32.totalorder %s998_s17, 1 }
   0x7   : > { %p140_p3 = scmp.lt.s32.totalorder %s998_s17, 3  ;;  %s1000_s22 = smov [#allocation4]  }
   0x8   : > { %p1062_p4 = por %p1054_p1, %p49_p0  ;;  %s155_s23 = sshll.u32 %s1000_s22, 4  ;;  %s156_s23 = int_to_ptr.vmem [resolvable:$true] %s155_s23 }
   0x9   : > { %p1066_p5 = pnand %p682_p2, %p140_p3  ;;  %s26_s25 = sadd.s32 1, %s994_s16 }
   0xa   : > { %s901_s26 = scalar_lea.vmem %s156_s23, 4096  ;;  %p909_p12 = scmp.lt.s32.totalorder %s156_s23, %s156_s23 }
   0xb   : > { %p774_p6 = pneg %p1066_p5  ;;  %p902_p9 = scmp.ne.s32.totalorder %s156_s23, %s901_s26 }
   0xc   : > { %p910_p13 = scmp.lt.s32.totalorder %s901_s26, %s901_s26 }
   0xd   : > { %p1074_p7 = pnand %p774_p6, %p1054_p1 }
   0xe   : > { %p911_p0 = por %p910_p13, %p909_p12 }
   0xf   : > { %p892_p8 = pneg %p1074_p7 }
  0x11   : > { %p904_p10 = pnand %p902_p9, %p892_p8 }
  0x13   : > { %p905_p11 = pneg %p904_p10 }
  0x15   : > { %p912_p2 = pnand %p911_p0, %p905_p11 }
  0x17   : > { %915 = shalt.err (!%p912_p2)
}
  0x18   : > { %s1001_s27 = smov 128   ;;  %s1002_s28 = smov 8  }
  0x19   : > { %777 = dma.hbm_to_vmem [thread:$0]  (!%p1074_p7), %s1170_s1, 4096, %s156_s23, [#allocation5], %s1001_s27, %s1001_s27, %s1002_s28  }
  0x1a   : > { %p27_p3 = scmp.ge.s32.totalorder %s26_s25, 2  ;;  %s36_s4 = sadd.s32 1, %s986_s14 }
  0x1b   : > { %p43_p6 = scmp.ne.s32.totalorder %s986_s14, %s982_s13  ;;  %p44_p8 = scmp.eq.s32.totalorder %s998_s17, 0 }
  0x1c   : > { %s1184_s25 = smov (%p27_p3, %s26_s25), 0  ;;  %p783_p10 = scmp.lt.s32.totalorder %s998_s17, 2 }
  0x1d   : > { %p45_p9 = por %p44_p8, %p43_p6  ;;  %s33_s5 = ssub.s32 %s994_s16, %s1184_s25 }
  0x1e   : > { %s176_s6 = sand.u32 1, %s986_s14   ;;  %p34_p11 = scmp.eq.s32.totalorder %s33_s5, 0 }
  0x1f   : > { %s686_s7 = sshll.u32 %s176_s6, 5  ;;  %s734_s8 = sshll.u32 %s994_s16, 9 }
  0x20   : > { %s1101_s9 = scalar_select %p34_p11, %s986_s14, %s36_s4  }
  0x21   : > { %s187_s12 = scalar_lea.hbm %s1169_s0, %s734_s8  ;;  %s180_s18 = scalar_lea.vmem [#allocation2], %s686_s7 }
  0x22   : > { %s188_s22 = sshll.u32 %s180_s18, 4  ;;  %p1106_p7 = pnand %p783_p10, %p45_p9  ;;  %s189_s22 = int_to_ptr.vmem [resolvable:$true] %s188_s22 }
  0x23   : > { %s177_s24 = scalar_lea.sflag [#allocation3], %s176_s6  ;;  %s929_s26 = scalar_lea.vmem %s189_s22, 512 }
  0x24   : > { %p918_p12 = pneg %p1106_p7  ;;  %p930_p13 = scmp.ne.s32.totalorder %s189_s22, %s929_s26 }
  0x25   : > { %s1003_s29 = smov [#allocation2]  }
  0x26   : > { %p932_p0 = pnand %p930_p13, %p918_p12  ;;  %s934_s30 = sshll.u32 %s1003_s29, 4  ;;  %s935_s30 = int_to_ptr.vmem [resolvable:$false] %s934_s30 }
  0x27   : > { %s936_s4 = scalar_lea.vmem %s935_s30, 1024  ;;  %p937_p3 = scmp.lt.s32.totalorder %s189_s22, %s935_s30 }
  0x28   : > { %p933_p2 = pneg %p932_p0  ;;  %p938_p6 = scmp.lt.s32.totalorder %s936_s4, %s929_s26 }
  0x2a   : > { %p939_p8 = por %p938_p6, %p937_p3 }
  0x2c   : > { %p940_p9 = pnand %p939_p8, %p933_p2 }
  0x2e   : > { %943 = shalt.err (!%p940_p9)
}
  0x2f   : > { %781 = dma.hbm_to_vmem [thread:$0]  (!%p1106_p7), %s187_s12, 512, %s189_s22, %s177_s24, %s1001_s27, %s1001_s27, %s1002_s28  }
  0x30   : > { %200 = sbr.rel (%p1066_p5) target bundleno = 326 (0x146), region = 32  ;;  %s202_s5 = sand.u32 (!%p1066_p5), 1, %s982_s13  }
  0x31   : > { %s691_s6 = sshll.u32 (!%p1066_p5), %s202_s5, 5  ;;  %s203_s7 = scalar_lea.sflag (!%p1066_p5), [#allocation3], %s202_s5 }
  0x32   : > { %s1120_s8 = scalar_lea.vmem (!%p1066_p5), [#allocation2], %s691_s6 }
  0x35   : > { %969 = dma.done.wait (%p1062_p4), %s203_s7, 512  }
  0x36   : > { %971 = vsyncadd (%p1062_p4), %s203_s7, 4294966784 }
  0x37   : > { %973 = dma.done.wait (%p1054_p1), [#allocation5], 4096  }
  0x38   : > { %975 = vsyncadd (%p1054_p1), [#allocation5], 4294963200  ;;  %v836_v0 = vld [vmem:[#allocation4 + $0x74] ss:$8 sps:$4 sm:$0xff]   ;;  %v838_v1 = vld [vmem:[#allocation4 + $0x70] ss:$8 sps:$4 sm:$0xff]  }
  0x39   : > { %473 = vmatprep.subr.bf16.mxu0 %v836_v0  ;;  %735 = vmatprep.subr.bf16.mxu1 %v836_v0  ;;  %v839_v2 = vld [vmem:[#allocation4 + $0x64] ss:$8 sps:$4 sm:$0xff]   ;;  %v841_v3 = vld [vmem:[#allocation4 + $0x60] ss:$8 sps:$4 sm:$0xff]   ;;  %v842_v4 = vld [vmem:[#allocation4 + $0x54] ss:$8 sps:$4 sm:$0xff]  }
  0x3a   : > { %474 = vmatpush1.bf16.msra.mxu0 %v838_v1  ;;  %751 = vmatpush1.bf16.msra.mxu1 %v838_v1  ;;  %v844_v5 = vld [vmem:[#allocation4 + $0x50] ss:$8 sps:$4 sm:$0xff]   ;;  %v845_v6 = vld [vmem:[#allocation4 + $0x44] ss:$8 sps:$4 sm:$0xff]   ;;  %v847_v7 = vld [vmem:[#allocation4 + $0x40] ss:$8 sps:$4 sm:$0xff]  }
  0x3b   : > { %475 = vmatprep.subr.bf16.mxu0 %v839_v2  ;;  %736 = vmatprep.subr.bf16.mxu1 %v839_v2  ;;  %v848_v8 = vld [vmem:[#allocation4 + $0x34] ss:$8 sps:$4 sm:$0xff]   ;;  %v850_v9 = vld [vmem:[#allocation4 + $0x30] ss:$8 sps:$4 sm:$0xff]   ;;  %v851_v10 = vld [vmem:[#allocation4 + $0x24] ss:$8 sps:$4 sm:$0xff]  }
  0x3c   : > { %v853_v11 = vld [vmem:[#allocation4 + $0x20] ss:$8 sps:$4 sm:$0xff]   ;;  %v854_v12 = vld [vmem:[#allocation4 + $0x14] ss:$8 sps:$4 sm:$0xff]   ;;  %v886_v13 = vld [vmem:[%s1120_s8 + $0x4] ss:$8 sps:$4 sm:$0xff]  }
  0x3d   : > { %v856_v14 = vld [vmem:[#allocation4 + $0x10] ss:$8 sps:$4 sm:$0xff]   ;;  %v889_v15 = vld [vmem:[%s1120_s8 + $0x14] ss:$8 sps:$4 sm:$0xff]   ;;  %v857_v16 = vld [vmem:[#allocation4 + $0x4] ss:$8 sps:$4 sm:$0xff]   ;;  %505 = vmatprep.mubr.bf16.mxu0 %v886_v13 }
  0x3e   : > { %476 = vmatpush1.bf16.msra.mxu0 %v841_v3  ;;  %752 = vmatpush1.bf16.msra.mxu1 %v841_v3  ;;  %v859_v17 = vld [vmem:[#allocation4] ss:$8 sps:$4 sm:$0xff]   ;;  %v860_v18 = vld [vmem:[#allocation4 + $0xf4] ss:$8 sps:$4 sm:$0xff]   ;;  %v862_v19 = vld [vmem:[#allocation4 + $0xf0] ss:$8 sps:$4 sm:$0xff]  }
  0x3f   : > { %477 = vmatprep.subr.bf16.mxu0 %v842_v4  ;;  %737 = vmatprep.subr.bf16.mxu1 %v842_v4  ;;  %v863_v20 = vld [vmem:[#allocation4 + $0xe4] ss:$8 sps:$4 sm:$0xff]   ;;  %v865_v21 = vld [vmem:[#allocation4 + $0xe0] ss:$8 sps:$4 sm:$0xff]   ;;  %v866_v22 = vld [vmem:[#allocation4 + $0xd4] ss:$8 sps:$4 sm:$0xff]  }
  0x40   : > { %515 = vmatprep.mubr.bf16.mxu1 %v889_v15  ;;  %v868_v23 = vld [vmem:[#allocation4 + $0xd0] ss:$8 sps:$4 sm:$0xff]   ;;  %v869_v24 = vld [vmem:[#allocation4 + $0xc4] ss:$8 sps:$4 sm:$0xff]   ;;  %v871_v25 = vld [vmem:[#allocation4 + $0xc0] ss:$8 sps:$4 sm:$0xff]  }
  0x41   : > { %v872_v26 = vld [vmem:[#allocation4 + $0xb4] ss:$8 sps:$4 sm:$0xff]   ;;  %v874_v27 = vld [vmem:[#allocation4 + $0xb0] ss:$8 sps:$4 sm:$0xff]   ;;  %v875_v28 = vld [vmem:[#allocation4 + $0xa4] ss:$8 sps:$4 sm:$0xff]  }
  0x42   : > { %478 = vmatpush1.bf16.msra.mxu0 %v844_v5  ;;  %753 = vmatpush1.bf16.msra.mxu1 %v844_v5  ;;  %v877_v29 = vld [vmem:[#allocation4 + $0xa0] ss:$8 sps:$4 sm:$0xff]   ;;  %v878_v30 = vld [vmem:[#allocation4 + $0x94] ss:$8 sps:$4 sm:$0xff]   ;;  %v880_v31 = vld [vmem:[#allocation4 + $0x90] ss:$8 sps:$4 sm:$0xff]  }
  0x43   : > { %479 = vmatprep.subr.bf16.mxu0 %v845_v6  ;;  %738 = vmatprep.subr.bf16.mxu1 %v845_v6  ;;  %v881_v32 = vld [vmem:[#allocation4 + $0x84] ss:$8 sps:$4 sm:$0xff]   ;;  %v883_v33 = vld [vmem:[#allocation4 + $0x80] ss:$8 sps:$4 sm:$0xff]   ;;  %v887_v35 = vld [vmem:[%s1120_s8 + $0x10] ss:$8 sps:$4 sm:$0xff]  }
  0x44   : > { %v884_v34 = vld [vmem:[%s1120_s8] ss:$8 sps:$4 sm:$0xff]   ;;  %s693_s19 = sshll.u32 %s990_s15, 1  ;;  %vm535_vm0 = vcmask 1040384  }
  0x45   : > { %p248_p1 = scmp.lt.s32.totalorder %s693_s19, 3  ;;  %v526_v36 = vld [vmem:[%s1171_s2] sm:$0x3] }
  0x46   : > { %480 = vmatpush1.bf16.msra.mxu0 %v847_v7  ;;  %754 = vmatpush1.bf16.msra.mxu1 %v847_v7  ;;  %v555_v45 = vrot.slane %v526_v36, 2 }
  0x47   : > { %481 = vmatprep.subr.bf16.mxu0 %v848_v8  ;;  %739 = vmatprep.subr.bf16.mxu1 %v848_v8  ;;  %s1186_s19 = smov (!%p248_p1, %s693_s19), 3 }
  0x48   : > { %s767_s20 = smul.u32 24, %s1186_s19 }
  0x4a   : > { %482 = vmatpush1.bf16.msra.mxu0 %v850_v9  ;;  %755 = vmatpush1.bf16.msra.mxu1 %v850_v9  ;;  %s1141_s11 = scalar_lea.vmem %s1172_s3, %s767_s20 }
  0x4b   : > { %483 = vmatprep.subr.bf16.mxu0 %v851_v10  ;;  %740 = vmatprep.subr.bf16.mxu1 %v851_v10 }
  0x4e   : > { %484 = vmatpush1.bf16.msra.mxu0 %v853_v11  ;;  %756 = vmatpush1.bf16.msra.mxu1 %v853_v11 }
  0x4f   : > { %485 = vmatprep.subr.bf16.mxu0 %v854_v12  ;;  %741 = vmatprep.subr.bf16.mxu1 %v854_v12 }
  0x52   : > { %486 = vmatpush1.bf16.msra.mxu0 %v856_v14  ;;  %757 = vmatpush1.bf16.msra.mxu1 %v856_v14 }
  0x53   : > { %487 = vmatprep.subr.bf16.mxu0 %v857_v16  ;;  %742 = vmatprep.subr.bf16.mxu1 %v857_v16 }
  0x56   : > { %488 = vmatpush1.bf16.msra.mxu0 %v859_v17  ;;  %758 = vmatpush1.bf16.msra.mxu1 %v859_v17 }
  0x57   : > { %489 = vmatprep.subr.bf16.mxu0 %v860_v18  ;;  %743 = vmatprep.subr.bf16.mxu1 %v860_v18 }
  0x5a   : > { %490 = vmatpush2.bf16.msra.mxu0 %v862_v19  ;;  %759 = vmatpush2.bf16.msra.mxu1 %v862_v19 }
  0x5b   : > { %491 = vmatprep.subr.bf16.mxu0 %v863_v20  ;;  %744 = vmatprep.subr.bf16.mxu1 %v863_v20 }
  0x5e   : > { %492 = vmatpush2.bf16.msra.mxu0 %v865_v21  ;;  %760 = vmatpush2.bf16.msra.mxu1 %v865_v21 }
  0x5f   : > { %493 = vmatprep.subr.bf16.mxu0 %v866_v22  ;;  %745 = vmatprep.subr.bf16.mxu1 %v866_v22 }
  0x62   : > { %494 = vmatpush2.bf16.msra.mxu0 %v868_v23  ;;  %761 = vmatpush2.bf16.msra.mxu1 %v868_v23 }
  0x63   : > { %495 = vmatprep.subr.bf16.mxu0 %v869_v24  ;;  %746 = vmatprep.subr.bf16.mxu1 %v869_v24 }
  0x66   : > { %496 = vmatpush2.bf16.msra.mxu0 %v871_v25  ;;  %762 = vmatpush2.bf16.msra.mxu1 %v871_v25 }
  0x67   : > { %497 = vmatprep.subr.bf16.mxu0 %v872_v26  ;;  %747 = vmatprep.subr.bf16.mxu1 %v872_v26 }
  0x6a   : > { %498 = vmatpush2.bf16.msra.mxu0 %v874_v27  ;;  %763 = vmatpush2.bf16.msra.mxu1 %v874_v27 }
  0x6b   : > { %499 = vmatprep.subr.bf16.mxu0 %v875_v28  ;;  %748 = vmatprep.subr.bf16.mxu1 %v875_v28 }
  0x6e   : > { %500 = vmatpush2.bf16.msra.mxu0 %v877_v29  ;;  %764 = vmatpush2.bf16.msra.mxu1 %v877_v29 }
  0x6f   : > { %501 = vmatprep.subr.bf16.mxu0 %v878_v30  ;;  %749 = vmatprep.subr.bf16.mxu1 %v878_v30 }
  0x72   : > { %502 = vmatpush2.bf16.msra.mxu0 %v880_v31  ;;  %765 = vmatpush2.bf16.msra.mxu1 %v880_v31 }
  0x73   : > { %503 = vmatprep.subr.bf16.mxu0 %v881_v32  ;;  %750 = vmatprep.subr.bf16.mxu1 %v881_v32 }
  0x76   : > { %504 = vmatpush2.bf16.msra.mxu0 %v883_v33  ;;  %766 = vmatpush2.bf16.msra.mxu1 %v883_v33 }
  0x79   : > { %506 = vmatmul.mubr.bf16.vlgmr.msra.gmra.mxu0 %v884_v34  ;;  %516 = vmatmul.mubr.bf16.vlgmr.msra.gmra.mxu1 %v887_v35 }
 0x139   : > { %v507_v37 = vpop.f32.mrf.mxu0  ;;  %v517_v38 = vpop.f32.mrf.mxu1 }
 0x13a   : > { %v527_v39 = vmul.f32 %v526_v36, %v507_v37  ;;  %v528_v40 = vmul.f32 %v526_v36, %v517_v38 }
 0x13b   : > { %v509_v41 = vpop.f32.mrf.mxu0  ;;  %v519_v42 = vpop.f32.mrf.mxu1 }
 0x13c   : > { %529 = vst [vmem:[%s1141_s11] sm:$0x1] %v527_v39  ;;  %v536_v43 = vrot.slane %v509_v41, 7  ;;  %v539_v44 = vrot.slane %v519_v42, 7  ;;  %530 = vst [vmem:[%s1141_s11 + $0x18] sm:$0x1] %v528_v40 }
 0x13d   : > { %v511_v46 = vpop.f32.mrf.mxu0  ;;  %v521_v47 = vpop.f32.mrf.mxu1 }
 0x13e   : > { %v546_v48 = vadd.f32 %v536_v43, %v507_v37  ;;  %v548_v49 = vadd.f32 %v539_v44, %v517_v38 }
 0x13f   : > { %v513_v50 = vpop.f32.mrf.mxu0  ;;  %v523_v51 = vpop.f32.mrf.mxu1 }
 0x140   : > { %550 = vst [vmem:[%s1141_s11] sm:$0xfe] %v546_v48  ;;  %v537_v52 = vrot.slane %v513_v50, 7  ;;  %v557_v53 = vmul.f32 %v555_v45, %v513_v50  ;;  %v540_v54 = vrot.slane %v523_v51, 7  ;;  %v558_v55 = vmul.f32 %v555_v45, %v523_v51  ;;  %552 = vst [vmem:[%s1141_s11 + $0x18] sm:$0xfe] %v548_v49 }
 0x142   : > { %v538_v56 = vsel %vm535_vm0, %v536_v43, %v537_v52  ;;  %559 = vst [vmem:[%s1141_s11 + $0x9] sm:$0x80] %v557_v53  ;;  %v541_v57 = vsel %vm535_vm0, %v539_v44, %v540_v54  ;;  %560 = vst [vmem:[%s1141_s11 + $0x21] sm:$0x80] %v558_v55 }
 0x143   : > { %v547_v58 = vadd.f32 %v538_v56, %v511_v46  ;;  %v549_v59 = vadd.f32 %v541_v57, %v521_v47 }
 0x145   : > { %551 = vst [vmem:[%s1141_s11 + $0x8] sm:$0xff] %v547_v58  ;;  %553 = vst [vmem:[%s1141_s11 + $0x20] sm:$0xff] %v549_v59 }
 0x146 PF: > { %s17_s17 = sadd.s32 1, %s998_s17   ;;  %s1178_s12 = smov %s982_s13 }
 0x147   : > { %p14_p4 = scmp.ge.s32.totalorder %s17_s17, 4   ;;  %s1179_s13 = smov %s986_s14 }
 0x148   : > { %s1180_s14 = smov %s1101_s9  ;;  %s1181_s15 = smov %s994_s16 }
 0x149   : > { %s1182_s16 = smov %s1184_s25  ;;  %16 = sbr.rel (!%p14_p4) target bundleno = 5 (0x5), region = 80 }
 0x14e   :  { %591 = vsyncpa [#allocation3], 1 }
 0x14f   :  { %593 = vsyncpa [#allocation3 + $0x1], 1 }
 0x150   :  { %594 = vsyncpa [#allocation5], 1 }

</bundles_post_ra>
